<compile_context>
chip_gen: v6e
topology: v6e:2x2x1
jax: 0.10.0
libtpu: 0.0.40
codegen_flags: <defaults>
</compile_context>

<pallas_src>
import functools

import jax
import jax.numpy as jnp
from jax.experimental import pallas as pl
from jax.experimental.pallas import tpu as pltpu

LANE = 128  # TPU lane width


def _round_up(n, m):
    return ((n + m - 1) // m) * m


def _elu_f32(x):
    # nn.ELU(alpha=1.0): x for x > 0, exp(x) - 1 otherwise (f32 on the VPU/EUP).
    return jnp.where(x > 0, x, jnp.exp(x) - 1.0)


def _decoder_kernel(x_ref, *refs):
    """MLP forward on one batch tile; weights/biases are VMEM-resident.

    refs = (w0, b0, w1, b1, ..., wL, bL, out_ref)
    Weights are bf16 (in_pad, out_pad); biases are f32 (1, out_pad).
    All layers except the last are followed by ELU.
    """
    out_ref = refs[-1]
    param_refs = refs[:-1]
    n_layers = len(param_refs) // 2

    h = x_ref[...].astype(jnp.float32)
    for layer in range(n_layers):
        w = param_refs[2 * layer][...]          # bf16, resident
        b = param_refs[2 * layer + 1][...]      # f32, (1, out_pad)
        # bf16 MXU matmul with f32 accumulation.
        y = jnp.dot(h.astype(jnp.bfloat16), w,
                    preferred_element_type=jnp.float32) + b
        if layer != n_layers - 1:
            h = _elu_f32(y)                     # keep elementwise math in f32
        else:
            h = y
    out_ref[...] = h.astype(out_ref.dtype)


def _padded_dims(input_size, hidden_dims, output_size):
    dims = [input_size] + list(hidden_dims) + [output_size]
    return [_round_up(d, LANE) for d in dims]


def _vmem_limit_bytes(tb, padded_dims):
    in_pad, out_pad = padded_dims[0], padded_dims[-1]
    x_tile = tb * in_pad * 4
    out_tile = tb * out_pad * 4
    w_bytes = sum(a * b * 2 for a, b in zip(padded_dims[:-1], padded_dims[1:]))
    b_bytes = sum(d * 4 for d in padded_dims[1:])
    # Double-buffer everything Pallas might double-buffer, plus headroom for
    # in-register intermediates / compiler scratch.
    total = 2 * (x_tile + out_tile + w_bytes + b_bytes) + 4 * 1024 * 1024
    # Stay within scoped-VMEM limits that work on every generation
    # (v7x physical VMEM is 64 MiB).
    return int(min(max(total, 16 * 1024 * 1024), 60 * 1024 * 1024))


@functools.partial(
    jax.jit, static_argnames=("input_size", "hidden_dims", "output_size", "tb")
)
def decoder_forward(x, params, *, input_size, hidden_dims, output_size, tb=128):
    """x: (B, input_size) f32; params: flat list [w0, b0, w1, b1, ...] with
    weights stored as (in_features, out_features) f32 and biases (out,) f32."""
    B = x.shape[0]
    dims_pad = _padded_dims(input_size, hidden_dims, output_size)
    in_pad, out_pad = dims_pad[0], dims_pad[-1]

    # Batch tile: multiple of 8 (f32 sublane), at most `tb`.
    tb_eff = min(tb, _round_up(B, 8))
    b_pad = _round_up(B, tb_eff)
    grid = (b_pad // tb_eff,)

    # --- pad input to (b_pad, in_pad) -------------------------------------
    x_p = jnp.zeros((b_pad, in_pad), jnp.float32).at[:B, :input_size].set(x)

    # --- pad params to lane-dense shapes; weights -> bf16 ------------------
    padded_params = []
    n_layers = len(params) // 2
    for layer in range(n_layers):
        w, b = params[2 * layer], params[2 * layer + 1]
        din, dout = w.shape
        dpi, dpo = dims_pad[layer], dims_pad[layer + 1]
        w_p = jnp.zeros((dpi, dpo), jnp.float32).at[:din, :dout].set(w)
        b_p = jnp.zeros((1, dpo), jnp.float32).at[0, :dout].set(b.reshape(-1))
        padded_params.append(w_p.astype(jnp.bfloat16))
        padded_params.append(b_p)

    # --- BlockSpecs ---------------------------------------------------------
    # x / out stream over the batch grid; weights & biases are resident
    # (constant block index -> DMA'd once, reused every grid step).
    in_specs = [pl.BlockSpec((tb_eff, in_pad), lambda i: (i, 0))]
    for p in padded_params:
        in_specs.append(pl.BlockSpec(p.shape, lambda i: (0, 0)))
    out_spec = pl.BlockSpec((tb_eff, out_pad), lambda i: (i, 0))

    out_padded = pl.pallas_call(
        _decoder_kernel,
        out_shape=jax.ShapeDtypeStruct((b_pad, out_pad), jnp.float32),
        grid=grid,
        in_specs=in_specs,
        out_specs=out_spec,
        compiler_params=pltpu.CompilerParams(
            dimension_semantics=("parallel",),  # megacore sharding on v7x
            vmem_limit_bytes=_vmem_limit_bytes(tb_eff, dims_pad),
        ),
    )(x_p, *padded_params)

    # Slice the real batch / output features back out.
    return out_padded[:B, :output_size]


def init_decoder_params(key, input_size, hidden_dims, output_size):
    """Deterministic synthetic init (uniform, PyTorch-Linear-like fan_in bound).

    Weights are stored transposed relative to PyTorch, i.e. (in, out);
    biases are (out,).
    """
    dims = [input_size] + list(hidden_dims) + [output_size]
    params = []
    for i in range(len(dims) - 1):
        fan_in, fan_out = dims[i], dims[i + 1]
        key, kw, kb = jax.random.split(key, 3)
        bound = 1.0 / jnp.sqrt(jnp.asarray(fan_in, jnp.float32))
        w = jax.random.uniform(kw, (fan_in, fan_out), jnp.float32, -bound, bound)
        b = jax.random.uniform(kb, (fan_out,), jnp.float32, -bound, bound)
        params.extend([w, b])
    return params


def decoder_reference_f32(x, params):
    """Pure-f32 pure-JAX reference (PyTorch semantics)."""
    n_layers = len(params) // 2
    h = x
    for layer in range(n_layers):
        w, b = params[2 * layer], params[2 * layer + 1]
        h = h @ w + b[None, :]
        if layer != n_layers - 1:
            h = _elu_f32(h)
    return h


def decoder_reference_bf16(x, params):
    """Reference emulating the kernel's bf16-matmul / f32-accumulate path."""
    n_layers = len(params) // 2
    h = x.astype(jnp.float32)
    for layer in range(n_layers):
        w, b = params[2 * layer], params[2 * layer + 1]
        h = jnp.dot(h.astype(jnp.bfloat16), w.astype(jnp.bfloat16),
                    preferred_element_type=jnp.float32) + b[None, :]
        if layer != n_layers - 1:
            h = _elu_f32(h)
    return h


if __name__ == "__main__":
    # Shapes consistent with the module:
    #   decoder(input_size=32, output_size=16, 'elu', hidden_dims=[64, 64]).
    batch = 256          # large enough to exercise the batch grid (2 tiles)
    input_size = 32
    hidden_dims = (64, 64)
    output_size = 16

    key = jax.random.PRNGKey(0)
    key, kx = jax.random.split(key)
    x = jax.random.normal(kx, (batch, input_size), jnp.float32)

    params = init_decoder_params(key, input_size, hidden_dims, output_size)

    out = decoder_forward(
        x, params,
        input_size=input_size, hidden_dims=hidden_dims, output_size=output_size,
        tb=128,
    )
    out = jax.block_until_ready(out)
    assert out.shape == (batch, output_size)

    # Tight check against a reference using the same bf16-matmul path.
    ref_bf16 = decoder_reference_bf16(x, params)
    assert jnp.allclose(out, ref_bf16, atol=1e-4, rtol=1e-4), \
        "mismatch vs bf16-path reference"

    # Loose check against the pure-f32 (PyTorch-semantics) reference;
    # difference is only bf16 weight/activation rounding in the matmuls.
    ref_f32 = decoder_reference_f32(x, params)
    assert jnp.allclose(out, ref_f32, atol=5e-2, rtol=5e-2), \
        "mismatch vs f32 reference"

    print("KERNEL_OK")
</pallas_src>

<mosaic_0001>
module attributes {stable_mosaic.version = 11 : i64} {
  func.func @_decoder_kernel(%arg0: i32, %arg1: memref<128x128xf32, #tpu.memory_space<vmem>>, %arg2: memref<128x128xbf16, #tpu.memory_space<vmem>>, %arg3: memref<1x128xf32, #tpu.memory_space<vmem>>, %arg4: memref<128x128xbf16, #tpu.memory_space<vmem>>, %arg5: memref<1x128xf32, #tpu.memory_space<vmem>>, %arg6: memref<128x128xbf16, #tpu.memory_space<vmem>>, %arg7: memref<1x128xf32, #tpu.memory_space<vmem>>, %arg8: memref<128x128xf32, #tpu.memory_space<vmem>>) attributes {dimension_semantics = [#tpu.dimension_semantics<parallel>], iteration_bounds = array<i64: 2>, scalar_prefetch = 0 : i64, scratch_operands = 0 : i64, tpu.core_type = #tpu.core_type<tc>, window_params = [{transform_indices = @transform_0, window_bounds = array<i64: 128, 128>}, {pipeline_mode = #tpu.pipeline_mode<synchronous>, transform_indices = @transform_1, window_bounds = array<i64: 128, 128>}, {pipeline_mode = #tpu.pipeline_mode<synchronous>, transform_indices = @transform_2, window_bounds = array<i64: 1, 128>}, {pipeline_mode = #tpu.pipeline_mode<synchronous>, transform_indices = @transform_3, window_bounds = array<i64: 128, 128>}, {pipeline_mode = #tpu.pipeline_mode<synchronous>, transform_indices = @transform_4, window_bounds = array<i64: 1, 128>}, {pipeline_mode = #tpu.pipeline_mode<synchronous>, transform_indices = @transform_5, window_bounds = array<i64: 128, 128>}, {pipeline_mode = #tpu.pipeline_mode<synchronous>, transform_indices = @transform_6, window_bounds = array<i64: 1, 128>}, {transform_indices = @transform_7, window_bounds = array<i64: 128, 128>}]} {
    %c0 = arith.constant 0 : index
    %c0_0 = arith.constant 0 : index
    %0 = vector.load %arg1[%c0, %c0_0] : memref<128x128xf32, #tpu.memory_space<vmem>>, vector<128x128xf32>
    %c0_1 = arith.constant 0 : index
    %c0_2 = arith.constant 0 : index
    %1 = vector.load %arg2[%c0_1, %c0_2] : memref<128x128xbf16, #tpu.memory_space<vmem>>, vector<128x128xbf16>
    %c0_3 = arith.constant 0 : index
    %c0_4 = arith.constant 0 : index
    %2 = vector.load %arg3[%c0_3, %c0_4] : memref<1x128xf32, #tpu.memory_space<vmem>>, vector<1x128xf32>
    %3 = arith.truncf %0 : vector<128x128xf32> to vector<128x128xbf16>
    %cst = arith.constant dense<0.000000e+00> : vector<128x128xf32>
    %4 = tpu.matmul %3, %1, %cst {dimension_numbers = #tpu.dot_dimension_numbers<[1], [0], [0], [1], [0, 0, 1, 1], [], []>} : vector<128x128xbf16>, vector<128x128xbf16>, vector<128x128xf32> -> vector<128x128xf32>
    %5 = vector.broadcast %2 : vector<1x128xf32> to vector<128x128xf32>
    %6 = arith.addf %4, %5 : vector<128x128xf32>
    %cst_5 = arith.constant 0.000000e+00 : f32
    %7 = vector.broadcast %cst_5 : f32 to vector<128x128xf32>
    %8 = arith.cmpf ogt, %6, %7 : vector<128x128xf32>
    %9 = math.exp %6 : vector<128x128xf32>
    %cst_6 = arith.constant 1.000000e+00 : f32
    %10 = vector.broadcast %cst_6 : f32 to vector<128x128xf32>
    %11 = arith.subf %9, %10 : vector<128x128xf32>
    %12 = arith.select %8, %6, %11 : vector<128x128xi1>, vector<128x128xf32>
    %c0_7 = arith.constant 0 : index
    %c0_8 = arith.constant 0 : index
    %13 = vector.load %arg4[%c0_7, %c0_8] : memref<128x128xbf16, #tpu.memory_space<vmem>>, vector<128x128xbf16>
    %c0_9 = arith.constant 0 : index
    %c0_10 = arith.constant 0 : index
    %14 = vector.load %arg5[%c0_9, %c0_10] : memref<1x128xf32, #tpu.memory_space<vmem>>, vector<1x128xf32>
    %15 = arith.truncf %12 : vector<128x128xf32> to vector<128x128xbf16>
    %cst_11 = arith.constant dense<0.000000e+00> : vector<128x128xf32>
    %16 = tpu.matmul %15, %13, %cst_11 {dimension_numbers = #tpu.dot_dimension_numbers<[1], [0], [0], [1], [0, 0, 1, 1], [], []>} : vector<128x128xbf16>, vector<128x128xbf16>, vector<128x128xf32> -> vector<128x128xf32>
    %17 = vector.broadcast %14 : vector<1x128xf32> to vector<128x128xf32>
    %18 = arith.addf %16, %17 : vector<128x128xf32>
    %cst_12 = arith.constant 0.000000e+00 : f32
    %19 = vector.broadcast %cst_12 : f32 to vector<128x128xf32>
    %20 = arith.cmpf ogt, %18, %19 : vector<128x128xf32>
    %21 = math.exp %18 : vector<128x128xf32>
    %cst_13 = arith.constant 1.000000e+00 : f32
    %22 = vector.broadcast %cst_13 : f32 to vector<128x128xf32>
    %23 = arith.subf %21, %22 : vector<128x128xf32>
    %24 = arith.select %20, %18, %23 : vector<128x128xi1>, vector<128x128xf32>
    %c0_14 = arith.constant 0 : index
    %c0_15 = arith.constant 0 : index
    %25 = vector.load %arg6[%c0_14, %c0_15] : memref<128x128xbf16, #tpu.memory_space<vmem>>, vector<128x128xbf16>
    %c0_16 = arith.constant 0 : index
    %c0_17 = arith.constant 0 : index
    %26 = vector.load %arg7[%c0_16, %c0_17] : memref<1x128xf32, #tpu.memory_space<vmem>>, vector<1x128xf32>
    %27 = arith.truncf %24 : vector<128x128xf32> to vector<128x128xbf16>
    %cst_18 = arith.constant dense<0.000000e+00> : vector<128x128xf32>
    %28 = tpu.matmul %27, %25, %cst_18 {dimension_numbers = #tpu.dot_dimension_numbers<[1], [0], [0], [1], [0, 0, 1, 1], [], []>} : vector<128x128xbf16>, vector<128x128xbf16>, vector<128x128xf32> -> vector<128x128xf32>
    %29 = vector.broadcast %26 : vector<1x128xf32> to vector<128x128xf32>
    %30 = arith.addf %28, %29 : vector<128x128xf32>
    %c0_19 = arith.constant 0 : index
    %c0_20 = arith.constant 0 : index
    %31 = vector.load %arg8[%c0_19, %c0_20] : memref<128x128xf32, #tpu.memory_space<vmem>>, vector<128x128xf32>
    tpu.vector_store %arg8[%c0_19, %c0_20], %30 {strides = array<i32>} : memref<128x128xf32, #tpu.memory_space<vmem>>, vector<128x128xf32>,
    return
  }
  func.func @transform_0(%arg0: i32) -> (i32, i32) {
    %c0_i32 = arith.constant 0 : i32
    %c0_i32_0 = arith.constant 0 : i32
    return %arg0, %c0_i32 : i32, i32
  }
  func.func @transform_1(%arg0: i32) -> (i32, i32) {
    %c0_i32 = arith.constant 0 : i32
    %c0_i32_0 = arith.constant 0 : i32
    %c0_i32_1 = arith.constant 0 : i32
    return %c0_i32, %c0_i32_0 : i32, i32
  }
  func.func @transform_2(%arg0: i32) -> (i32, i32) {
    %c0_i32 = arith.constant 0 : i32
    %c0_i32_0 = arith.constant 0 : i32
    %c0_i32_1 = arith.constant 0 : i32
    return %c0_i32, %c0_i32_0 : i32, i32
  }
  func.func @transform_3(%arg0: i32) -> (i32, i32) {
    %c0_i32 = arith.constant 0 : i32
    %c0_i32_0 = arith.constant 0 : i32
    %c0_i32_1 = arith.constant 0 : i32
    return %c0_i32, %c0_i32_0 : i32, i32
  }
  func.func @transform_4(%arg0: i32) -> (i32, i32) {
    %c0_i32 = arith.constant 0 : i32
    %c0_i32_0 = arith.constant 0 : i32
    %c0_i32_1 = arith.constant 0 : i32
    return %c0_i32, %c0_i32_0 : i32, i32
  }
  func.func @transform_5(%arg0: i32) -> (i32, i32) {
    %c0_i32 = arith.constant 0 : i32
    %c0_i32_0 = arith.constant 0 : i32
    %c0_i32_1 = arith.constant 0 : i32
    return %c0_i32, %c0_i32_0 : i32, i32
  }
  func.func @transform_6(%arg0: i32) -> (i32, i32) {
    %c0_i32 = arith.constant 0 : i32
    %c0_i32_0 = arith.constant 0 : i32
    %c0_i32_1 = arith.constant 0 : i32
    return %c0_i32, %c0_i32_0 : i32, i32
  }
  func.func @transform_7(%arg0: i32) -> (i32, i32) {
    %c0_i32 = arith.constant 0 : i32
    %c0_i32_0 = arith.constant 0 : i32
    return %arg0, %c0_i32 : i32, i32
  }
}

</mosaic_0001>

<bundles_post_ra>
// kernel: decoder_forward.1
= control target key start
LH: loop header
LB: loop body
LE: loop exit
PB: predicated region body
PF: predicated region fallthrough
CT: control target
= control target key end

     0   :  { %s1433_s24 = smov 0   ;;  %s1736_s0 = inlined_call_operand.vmem [shape: f32[256,128], index: 0, kind: input, shape index: {}]   ;;  %s1737_s1 = inlined_call_operand.vmem [shape: bf16[128,128], index: 1, kind: input, shape index: {}]   ;;  %s1738_s2 = inlined_call_operand.vmem [shape: f32[1,128], index: 2, kind: input, shape index: {}]   ;;  %s1739_s3 = inlined_call_operand.vmem [shape: bf16[128,128], index: 3, kind: input, shape index: {}]   ;;  %s1740_s4 = inlined_call_operand.vmem [shape: f32[1,128], index: 4, kind: input, shape index: {}]   ;;  %s1741_s5 = inlined_call_operand.vmem [shape: bf16[128,128], index: 5, kind: input, shape index: {}]   ;;  %s1742_s6 = inlined_call_operand.vmem [shape: f32[1,128], index: 6, kind: input, shape index: {}]   ;;  %s1743_s7 = inlined_call_operand.vmem [shape: f32[256,128], index: 7, kind: output, shape index: {}]  }
   0x1 LB: > { %s1059_s25 = sadd.s32 4294967295, %s1391_s24   ;;  %p1063_p0 = scmp.ge.s32.totalorder %s1391_s24, 1  ;;  %s1391_s24 = sphi %s1433_s24, %s17_s24  }
   0x2   : > { %p238_p1 = scmp.lt.s32.totalorder %s1391_s24, 3 }
   0x4   : > { %p239_p2 = pnand %p1063_p0, %p238_p1 }
   0x5   : > { %s1064_s28 = sshll.u32 (!%p239_p2), %s1059_s25, 4 }
   0x6   : > { %242 = sbr.rel (%p239_p2) target bundleno = 716 (0x2cc), region = 48  ;;  %p271_p3 = scmp.lt.s32.totalorder (!%p239_p2), %s1064_s28, 31 }
   0xb   : > { %v1297_v0 = vld [vmem:[%s1737_s1 + $0x38] sm:$0xff]   ;;  %v1298_v1 = vld [vmem:[%s1737_s1 + $0x30] sm:$0xff]   ;;  %s1745_s28 = smov (!%p271_p3, %s1064_s28), 31  ;;  %v1299_v2 = vld [vmem:[%s1737_s1 + $0x28] sm:$0xff]  }
   0xc   : > { %1177 = vmatprep.subr.bf16.mxu0 %v1297_v0  ;;  %s1065_s10 = sshll.u32 %s1745_s28, 3  ;;  %v1300_v3 = vld [vmem:[%s1737_s1 + $0x20] sm:$0xff]   ;;  %v1301_v7 = vld [vmem:[%s1737_s1 + $0x18] sm:$0xff]   ;;  %v1302_v8 = vld [vmem:[%s1737_s1 + $0x10] sm:$0xff]  }
   0xd   : > { %1178 = vmatpush3.bf16.msra.mxu0 %v1297_v0  ;;  %s1458_s13 = scalar_lea.vmem %s1736_s0, %s1065_s10  ;;  %v1305_v9 = vld [vmem:[%s1739_s3 + $0x38] sm:$0xff]   ;;  %v1303_v10 = vld [vmem:[%s1737_s1 + $0x8] sm:$0xff]   ;;  %v1304_v11 = vld [vmem:[%s1737_s1] sm:$0xff]   ;;  %s1715_s25 = scalar_lea.vmem %s1743_s7, %s1065_s10 }
   0xe   : > { %1179 = vmatprep.subr.bf16.mxu0 %v1298_v1  ;;  %v283_v4 = vld [vmem:[%s1458_s13] sm:$0xff]  ;;  %v284_v5 = vld [vmem:[%s1458_s13 + $0x8] sm:$0xff]  ;;  %1209 = vmatprep.subr.bf16.mxu1 %v1305_v9  ;;  %v285_v12 = vld [vmem:[%s1458_s13 + $0x10] sm:$0xff] }
   0xf   : > { %v316_v6 = vpack.c.bf16 %v284_v5, %v283_v4  ;;  %1210 = vmatpush3.bf16.msra.mxu1 %v1305_v9  ;;  %v286_v13 = vld [vmem:[%s1458_s13 + $0x18] sm:$0xff]  ;;  %v287_v14 = vld [vmem:[%s1458_s13 + $0x20] sm:$0xff]  ;;  %v288_v15 = vld [vmem:[%s1458_s13 + $0x28] sm:$0xff] }
  0x10   : > { %v317_v16 = vpack.c.bf16 %v286_v13, %v285_v12  ;;  %v318_v17 = vpack.c.bf16 %v288_v15, %v287_v14  ;;  %v289_v18 = vld [vmem:[%s1458_s13 + $0x30] sm:$0xff]  ;;  %v290_v19 = vld [vmem:[%s1458_s13 + $0x38] sm:$0xff]  ;;  %v291_v20 = vld [vmem:[%s1458_s13 + $0x40] sm:$0xff] }
  0x11   : > { %1180 = vmatpush3.bf16.msra.mxu0 %v1298_v1  ;;  %1193 = vmatprep.mubr.bf16.mxu0 %v316_v6  ;;  %v292_v21 = vld [vmem:[%s1458_s13 + $0x48] sm:$0xff]  ;;  %v319_v22 = vpack.c.bf16 %v290_v19, %v289_v18  ;;  %v293_v24 = vld [vmem:[%s1458_s13 + $0x50] sm:$0xff]  ;;  %v294_v25 = vld [vmem:[%s1458_s13 + $0x58] sm:$0xff] }
  0x12   : > { %1181 = vmatprep.subr.bf16.mxu0 %v1299_v2  ;;  %v320_v23 = vpack.c.bf16 %v292_v21, %v291_v20  ;;  %v295_v26 = vld [vmem:[%s1458_s13 + $0x60] sm:$0xff]  ;;  %v296_v27 = vld [vmem:[%s1458_s13 + $0x68] sm:$0xff]  ;;  %v321_v28 = vpack.c.bf16 %v294_v25, %v293_v24  ;;  %v297_v30 = vld [vmem:[%s1458_s13 + $0x70] sm:$0xff] }
  0x13   : > { %v322_v29 = vpack.c.bf16 %v296_v27, %v295_v26  ;;  %v298_v31 = vld [vmem:[%s1458_s13 + $0x78] sm:$0xff]  ;;  %v1306_v33 = vld [vmem:[%s1739_s3 + $0x30] sm:$0xff]   ;;  %v1307_v34 = vld [vmem:[%s1739_s3 + $0x28] sm:$0xff]  }
  0x14   : > { %v323_v32 = vpack.c.bf16 %v298_v31, %v297_v30  ;;  %1211 = vmatprep.subr.bf16.mxu1 %v1306_v33  ;;  %v1308_v35 = vld [vmem:[%s1739_s3 + $0x20] sm:$0xff]   ;;  %v1309_v36 = vld [vmem:[%s1739_s3 + $0x18] sm:$0xff]   ;;  %v1310_v37 = vld [vmem:[%s1739_s3 + $0x10] sm:$0xff]  }
  0x15   : > { %1182 = vmatpush3.bf16.msra.mxu0 %v1299_v2  ;;  %1212 = vmatpush3.bf16.msra.mxu1 %v1306_v33  ;;  %v1311_v38 = vld [vmem:[%s1739_s3 + $0x8] sm:$0xff]   ;;  %v1312_v39 = vld [vmem:[%s1739_s3] sm:$0xff]   ;;  %v1518_v40 = vld [vmem:[%s1741_s5 + $0x38] sm:$0xff]  }
  0x16   : > { %1183 = vmatprep.subr.bf16.mxu0 %v1300_v3  ;;  %1213 = vmatprep.subr.bf16.mxu1 %v1307_v34  ;;  %v1526_v41 = vld [vmem:[%s1738_s2] ss:$0 sm:$0xff] }
  0x19   : > { %1184 = vmatpush3.bf16.msra.mxu0 %v1300_v3  ;;  %1214 = vmatpush3.bf16.msra.mxu1 %v1307_v34 }
  0x1a   : > { %1185 = vmatprep.subr.bf16.mxu0 %v1301_v7  ;;  %1215 = vmatprep.subr.bf16.mxu1 %v1308_v35 }
  0x1d   : > { %1186 = vmatpush3.bf16.msra.mxu0 %v1301_v7  ;;  %1216 = vmatpush3.bf16.msra.mxu1 %v1308_v35 }
  0x1e   : > { %1187 = vmatprep.subr.bf16.mxu0 %v1302_v8  ;;  %1217 = vmatprep.subr.bf16.mxu1 %v1309_v36 }
  0x21   : > { %1188 = vmatpush3.bf16.msra.mxu0 %v1302_v8  ;;  %1218 = vmatpush3.bf16.msra.mxu1 %v1309_v36 }
  0x22   : > { %1189 = vmatprep.subr.bf16.mxu0 %v1303_v10  ;;  %1219 = vmatprep.subr.bf16.mxu1 %v1310_v37 }
  0x25   : > { %1190 = vmatpush3.bf16.msra.mxu0 %v1303_v10  ;;  %1220 = vmatpush3.bf16.msra.mxu1 %v1310_v37 }
  0x26   : > { %1191 = vmatprep.subr.bf16.mxu0 %v1304_v11  ;;  %1221 = vmatprep.subr.bf16.mxu1 %v1311_v38 }
  0x29   : > { %1192 = vmatpush3.bf16.msra.mxu0 %v1304_v11  ;;  %1222 = vmatpush3.bf16.msra.mxu1 %v1311_v38 }
  0x2a   : > { %1223 = vmatprep.subr.bf16.mxu1 %v1312_v39  ;;  %1241 = vmatprep.subr.bf16.mxu0 %v1518_v40 }
  0x2c   : > { %1194 = vmatmul.mubr.bf16.vlgmr.msra.gmra.mxu0 %v317_v16 }
  0x2d   : > { %1197 = vmatprep.mubr.bf16.mxu0 %v318_v17  ;;  %1224 = vmatpush3.bf16.msra.mxu1 %v1312_v39 }
  0x2e   : > { %1273 = vmatprep.subr.bf16.mxu1 %v1518_v40  ;;  %1242 = vmatpush3.bf16.msra.mxu0 %v1518_v40 }
  0x34   : > { %1198 = vmatmul.mubr.bf16.gmra.mxu0 %v319_v22 }
  0x35   : > { %1201 = vmatprep.mubr.bf16.mxu0 %v320_v23 }
  0x3c   : > { %1202 = vmatmul.mubr.bf16.gmra.mxu0 %v321_v28 }
  0x3d   : > { %1205 = vmatprep.mubr.bf16.mxu0 %v322_v29 }
  0x44   : > { %1206 = vmatmul.mubr.bf16.gmra.mxu0 %v323_v32 }
  0xec   : > { %v1195_v42 = vpop.f32.mrf.mxu0 }
  0xed   : > { %v1529_v43 = vadd.f32 %v1195_v42, %v1526_v41 }
  0xee   : > { %v412_v44 = vpop.f32.mrf.mxu0 }
  0xef   : > { %v495_v45 = vmul.f32 1.442695, %v1529_v43  ;;  %v1533_v46 = vadd.f32 %v1526_v41, %v412_v44  ;;  %vm477_vm3 = vcmp.gt.f32.partialorder %v1529_v43, 0.0 }
  0xf0   : > { %v1196_v47 = vpop.f32.mrf.mxu0 }
  0xf1   : > { %v491_v48 = vmul.f32 1.442695, %v1533_v46  ;;  %v424_v49 = vadd.f32 %v1196_v47, %v1526_v41  ;;  %1321 = vpow2.f32 %v495_v45  ;;  %vm475_vm1 = vcmp.gt.f32.partialorder %v1533_v46, 0.0 }
  0xf2   : > { %v415_v50 = vpop.f32.mrf.mxu0 }
  0xf3   : > { %v497_v51 = vmul.f32 1.442695, %v424_v49  ;;  %v416_v52 = vadd.f32 %v1526_v41, %v415_v50  ;;  %1323 = vpow2.f32 %v491_v48  ;;  %vm478_vm0 = vcmp.gt.f32.partialorder %v424_v49, 0.0 }
  0xf4   : > { %v1199_v53 = vpop.f32.mrf.mxu0 }
  0xf5   : > { %1325 = vpow2.f32 %v497_v51  ;;  %v493_v54 = vmul.f32 1.442695, %v416_v52  ;;  %v1539_v55 = vadd.f32 %v1199_v53, %v1526_v41  ;;  %vm476_vm2 = vcmp.gt.f32.partialorder %v416_v52, 0.0 }
  0xf6   : > { %v428_v56 = vpop.f32.mrf.mxu0 }
  0xf7   : > { %1327 = vpow2.f32 %v493_v54  ;;  %v1542_v57 = vadd.f32 %v1526_v41, %v428_v56  ;;  %v503_v58 = vmul.f32 1.442695, %v1539_v55  ;;  %vm481_vm7 = vcmp.gt.f32.partialorder %v1539_v55, 0.0 }
  0xf8   : > { %v1200_v59 = vpop.f32.mrf.mxu0 }
  0xf9   : > { %v499_v60 = vmul.f32 1.442695, %v1542_v57  ;;  %v1547_v61 = vadd.f32 %v1200_v59, %v1526_v41  ;;  %vm479_vm4 = vcmp.gt.f32.partialorder %v1542_v57, 0.0 }
  0xfa   : > { %v431_v62 = vpop.f32.mrf.mxu0 }
  0xfb   : > { %1329 = vpow2.f32 %v499_v60  ;;  %v505_v63 = vmul.f32 1.442695, %v1547_v61  ;;  %v1551_v0 = vadd.f32 %v1526_v41, %v431_v62  ;;  %vm482_vm5 = vcmp.gt.f32.partialorder %v1547_v61, 0.0 }
  0xfc   : > { %1331 = vpow2.f32 %v503_v58  ;;  %v1203_v1 = vpop.f32.mrf.mxu0 }
  0xfd   : > { %1333 = vpow2.f32 %v505_v63  ;;  %v501_v2 = vmul.f32 1.442695, %v1551_v0  ;;  %v1555_v3 = vadd.f32 %v1203_v1, %v1526_v41  ;;  %vm480_vm6 = vcmp.gt.f32.partialorder %v1551_v0, 0.0 }
  0xfe   : > { %v444_v4 = vpop.f32.mrf.mxu0  ;;  %v1322_v6 = vpop.eup %1321 }
  0xff   : > { %1335 = vpow2.f32 %v501_v2  ;;  %v511_v5 = vmul.f32 1.442695, %v1555_v3  ;;  %v1559_v7 = vadd.f32 %v1526_v41, %v444_v4  ;;  %v1079_v20 = vadd.f32 -1.0, %v1322_v6 }
 0x100   : > { %v1204_v8 = vpop.f32.mrf.mxu0  ;;  %v1324_v9 = vpop.eup %1323  ;;  %vm485_vm11 = vcmp.gt.f32.partialorder %v1555_v3, 0.0 }
 0x101   : > { %v1562_v10 = vadd.f32 %v1204_v8, %v1526_v41  ;;  %v507_v12 = vmul.f32 1.442695, %v1559_v7  ;;  %1337 = vpow2.f32 %v511_v5  ;;  %v1077_v19 = vadd.f32 -1.0, %v1324_v9 }
 0x102   : > { %v1326_v11 = vpop.eup %1325  ;;  %v447_v13 = vpop.f32.mrf.mxu0  ;;  %v541_v35 = vsel %vm477_vm3, %v1529_v43, %v1079_v20  ;;  %vm483_vm8 = vcmp.gt.f32.partialorder %v1559_v7, 0.0  ;;  %v1316_v20 = vld [vmem:[%s1741_s5 + $0x20] sm:$0xff]  }
 0x103   : > { %v1080_v14 = vadd.f32 -1.0, %v1326_v11  ;;  %v513_v15 = vmul.f32 1.442695, %v1562_v10  ;;  %v1567_v16 = vadd.f32 %v1526_v41, %v447_v13  ;;  %1339 = vpow2.f32 %v507_v12 }
 0x104   : > { %v1328_v17 = vpop.eup %1327  ;;  %v1207_v18 = vpop.f32.mrf.mxu0  ;;  %v539_v30 = vsel %vm475_vm1, %v1533_v46, %v1077_v19  ;;  %vm486_vm9 = vcmp.gt.f32.partialorder %v1562_v10, 0.0  ;;  %v1315_v19 = vld [vmem:[%s1741_s5 + $0x28] sm:$0xff]  }
 0x105   : > { %1341 = vpow2.f32 %v513_v15  ;;  %v509_v21 = vmul.f32 1.442695, %v1567_v16  ;;  %v1571_v22 = vadd.f32 %v1207_v18, %v1526_v41  ;;  %v1078_v24 = vadd.f32 -1.0, %v1328_v17  ;;  %v1314_v18 = vld [vmem:[%s1741_s5 + $0x30] sm:$0xff]  }
 0x106   : > { %v460_v23 = vpop.f32.mrf.mxu0  ;;  %v542_v26 = vsel %vm478_vm0, %v424_v49, %v1080_v14  ;;  %vm484_vm10 = vcmp.gt.f32.partialorder %v1567_v16, 0.0  ;;  %1243 = vmatprep.subr.bf16.mxu0 %v1314_v18 }
 0x107   : > { %1343 = vpow2.f32 %v509_v21  ;;  %v519_v25 = vmul.f32 1.442695, %v1571_v22  ;;  %v1577_v28 = vadd.f32 %v1526_v41, %v460_v23  ;;  %v540_v31 = vsel %vm476_vm2, %v416_v52, %v1078_v24  ;;  %1244 = vmatpush3.bf16.msra.mxu0 %v1314_v18  ;;  %v1317_v21 = vld [vmem:[%s1741_s5 + $0x18] sm:$0xff]   ;;  %v1319_v23 = vld [vmem:[%s1741_s5 + $0x8] sm:$0xff]   ;;  %v1320_v24 = vld [vmem:[%s1741_s5] sm:$0xff]  }
 0x108   : > { %v1330_v27 = vpop.eup %1329  ;;  %v1208_v29 = vpop.f32.mrf.mxu0  ;;  %v572_v34 = vpack.c.bf16 %v540_v31, %v539_v30  ;;  %v573_v42 = vpack.c.bf16 %v542_v26, %v541_v35  ;;  %vm489_vm15 = vcmp.gt.f32.partialorder %v1571_v22, 0.0  ;;  %1245 = vmatprep.subr.bf16.mxu0 %v1315_v19 }
 0x109   : > { %v1332_v32 = vpop.eup %1331  ;;  %v1581_v33 = vadd.f32 %v1208_v29, %v1526_v41  ;;  %v1081_v37 = vadd.f32 -1.0, %v1330_v27  ;;  %v515_v38 = vmul.f32 1.442695, %v1577_v28  ;;  %1345 = vpow2.f32 %v519_v25  ;;  %v1634_v25 = vld [vmem:[%s1740_s4] ss:$0 sm:$0xff] }
 0x10a   : > { %v1334_v36 = vpop.eup %1333  ;;  %v463_v39 = vpop.f32.mrf.mxu0  ;;  %1225 = vmatprep.mubr.bf16.mxu1 %v572_v34  ;;  %v1083_v48 = vadd.f32 -1.0, %v1332_v32  ;;  %vm487_vm12 = vcmp.gt.f32.partialorder %v1577_v28, 0.0 }
 0x10b   : > { %v1084_v44 = vadd.f32 -1.0, %v1334_v36  ;;  %v521_v45 = vmul.f32 1.442695, %v1581_v33  ;;  %v464_v46 = vadd.f32 %v1526_v41, %v463_v39  ;;  %1347 = vpow2.f32 %v515_v38  ;;  %1226 = vmatmul.mubr.bf16.vlgmr.msra.gmra.mxu1 %v573_v42  ;;  %1246 = vmatpush3.bf16.msra.mxu0 %v1315_v19 }
 0x10c   : > { %v1336_v47 = vpop.eup %1335  ;;  %1281 = vmatpush3.bf16.msra.mxu1 %v1518_v40  ;;  %v543_v50 = vsel %vm479_vm4, %v1542_v57, %v1081_v37  ;;  %v545_v40 = vsel %vm481_vm7, %v1539_v55, %v1083_v48  ;;  %vm490_vm13 = vcmp.gt.f32.partialorder %v1581_v33, 0.0  ;;  %1247 = vmatprep.subr.bf16.mxu0 %v1316_v20 }
 0x10d   : > { %v1082_v49 = vadd.f32 -1.0, %v1336_v47  ;;  %1349 = vpow2.f32 %v521_v45  ;;  %v517_v43 = vmul.f32 1.442695, %v464_v46  ;;  %v546_v51 = vsel %vm482_vm5, %v1547_v61, %v1084_v44  ;;  %1274 = vmatprep.subr.bf16.mxu1 %v1314_v18 }
 0x10e   : > { %v1338_v52 = vpop.eup %1337  ;;  %v575_v58 = vpack.c.bf16 %v546_v51, %v545_v40  ;;  %vm488_vm14 = vcmp.gt.f32.partialorder %v464_v46, 0.0 }
 0x10f   : > { %1351 = vpow2.f32 %v517_v43  ;;  %v544_v41 = vsel %vm480_vm6, %v1551_v0, %v1082_v49  ;;  %v1087_v63 = vadd.f32 -1.0, %v1338_v52  ;;  %1248 = vmatpush3.bf16.msra.mxu0 %v1316_v20 }
 0x110   : > { %v574_v53 = vpack.c.bf16 %v544_v41, %v543_v50  ;;  %v1340_v54 = vpop.eup %1339  ;;  %1282 = vmatpush3.bf16.msra.mxu1 %v1314_v18  ;;  %1249 = vmatprep.subr.bf16.mxu0 %v1317_v21 }
 0x111   : > { %v1085_v59 = vadd.f32 -1.0, %v1340_v54  ;;  %v549_v5 = vsel %vm485_vm11, %v1555_v3, %v1087_v63  ;;  %1275 = vmatprep.subr.bf16.mxu1 %v1315_v19 }
 0x112   : > { %v1342_v56 = vpop.eup %1341  ;;  %1229 = vmatprep.mubr.bf16.mxu1 %v574_v53 }
 0x113   : > { %v1088_v60 = vadd.f32 -1.0, %v1342_v56  ;;  %1230 = vmatmul.mubr.bf16.gmra.mxu1 %v575_v58  ;;  %v547_v61 = vsel %vm483_vm8, %v1559_v7, %v1085_v59  ;;  %1250 = vmatpush3.bf16.msra.mxu0 %v1317_v21 }
 0x114   : > { %v1344_v62 = vpop.eup %1343  ;;  %1283 = vmatpush3.bf16.msra.mxu1 %v1315_v19 }
 0x115   : > { %v1086_v57 = vadd.f32 -1.0, %v1344_v62  ;;  %v550_v55 = vsel %vm486_vm9, %v1562_v10, %v1088_v60  ;;  %1276 = vmatprep.subr.bf16.mxu1 %v1316_v20 }
 0x116   : > { %v1346_v1 = vpop.eup %1345  ;;  %v577_v8 = vpack.c.bf16 %v550_v55, %v549_v5 }
 0x117   : > { %v548_v0 = vsel %vm484_vm10, %v1567_v16, %v1086_v57  ;;  %v1091_v13 = vadd.f32 -1.0, %v1346_v1 }
 0x118   : > { %v576_v2 = vpack.c.bf16 %v548_v0, %v547_v61  ;;  %v1348_v4 = vpop.eup %1347  ;;  %1284 = vmatpush3.bf16.msra.mxu1 %v1316_v20 }
 0x119   : > { %v1089_v9 = vadd.f32 -1.0, %v1348_v4  ;;  %v553_v16 = vsel %vm489_vm15, %v1571_v22, %v1091_v13  ;;  %1277 = vmatprep.subr.bf16.mxu1 %v1317_v21  ;;  %v1318_v22 = vld [vmem:[%s1741_s5 + $0x10] sm:$0xff]  }
 0x11a   : > { %v1350_v6 = vpop.eup %1349  ;;  %1233 = vmatprep.mubr.bf16.mxu1 %v576_v2  ;;  %1251 = vmatprep.subr.bf16.mxu0 %v1318_v22 }
 0x11b   : > { %v1092_v11 = vadd.f32 -1.0, %v1350_v6  ;;  %1234 = vmatmul.mubr.bf16.gmra.mxu1 %v577_v8  ;;  %v551_v10 = vsel %vm487_vm12, %v1577_v28, %v1089_v9  ;;  %1252 = vmatpush3.bf16.msra.mxu0 %v1318_v22 }
 0x11c   : > { %v1352_v12 = vpop.eup %1351  ;;  %1285 = vmatpush3.bf16.msra.mxu1 %v1317_v21  ;;  %1253 = vmatprep.subr.bf16.mxu0 %v1319_v23 }
 0x11d   : > { %v1090_v7 = vadd.f32 -1.0, %v1352_v12  ;;  %v554_v15 = vsel %vm490_vm13, %v1581_v33, %v1092_v11  ;;  %1278 = vmatprep.subr.bf16.mxu1 %v1318_v22 }
 0x11e   : > { %v579_v17 = vpack.c.bf16 %v554_v15, %v553_v16 }
 0x11f   : > { %v552_v14 = vsel %vm488_vm14, %v464_v46, %v1090_v7  ;;  %1254 = vmatpush3.bf16.msra.mxu0 %v1319_v23 }
 0x120   : > { %v578_v3 = vpack.c.bf16 %v552_v14, %v551_v10  ;;  %1286 = vmatpush3.bf16.msra.mxu1 %v1318_v22  ;;  %1255 = vmatprep.subr.bf16.mxu0 %v1320_v24 }
 0x121   : > { %1279 = vmatprep.subr.bf16.mxu1 %v1319_v23 }
 0x122   : > { %1237 = vmatprep.mubr.bf16.mxu1 %v578_v3 }
 0x123   : > { %1238 = vmatmul.mubr.bf16.gmra.mxu1 %v579_v17  ;;  %1256 = vmatpush3.bf16.msra.mxu0 %v1320_v24 }
 0x124   : > { %1287 = vmatpush3.bf16.msra.mxu1 %v1319_v23 }
 0x125   : > { %1280 = vmatprep.subr.bf16.mxu1 %v1320_v24 }
 0x128   : > { %1288 = vmatpush3.bf16.msra.mxu1 %v1320_v24 }
 0x1cb   : > { %v1227_v26 = vpop.f32.mrf.mxu1 }
 0x1cc   : > { %v1637_v27 = vadd.f32 %v1227_v26, %v1634_v25 }
 0x1cd   : > { %v668_v28 = vpop.f32.mrf.mxu1 }
 0x1ce   : > { %v669_v29 = vadd.f32 %v1634_v25, %v668_v28  ;;  %v751_v30 = vmul.f32 1.442695, %v1637_v27  ;;  %vm733_vm3 = vcmp.gt.f32.partialorder %v1637_v27, 0.0 }
 0x1cf   : > { %v1228_v31 = vpop.f32.mrf.mxu1 }
 0x1d0   : > { %v747_v32 = vmul.f32 1.442695, %v669_v29  ;;  %v680_v33 = vadd.f32 %v1228_v31, %v1634_v25  ;;  %vm731_vm0 = vcmp.gt.f32.partialorder %v669_v29, 0.0 }
 0x1d1   : > { %v671_v34 = vpop.f32.mrf.mxu1 }
 0x1d2   : > { %1353 = vpow2.f32 %v747_v32  ;;  %v753_v35 = vmul.f32 1.442695, %v680_v33  ;;  %v672_v36 = vadd.f32 %v1634_v25, %v671_v34  ;;  %vm734_vm1 = vcmp.gt.f32.partialorder %v680_v33, 0.0 }
 0x1d3   : > { %1355 = vpow2.f32 %v751_v30  ;;  %v1231_v37 = vpop.f32.mrf.mxu1 }
 0x1d4   : > { %1357 = vpow2.f32 %v753_v35  ;;  %v749_v38 = vmul.f32 1.442695, %v672_v36  ;;  %v1644_v39 = vadd.f32 %v1231_v37, %v1634_v25  ;;  %vm732_vm2 = vcmp.gt.f32.partialorder %v672_v36, 0.0 }
 0x1d5   : > { %v684_v42 = vpop.f32.mrf.mxu1 }
 0x1d6   : > { %1359 = vpow2.f32 %v749_v38  ;;  %v1647_v44 = vadd.f32 %v1634_v25, %v684_v42  ;;  %v759_v45 = vmul.f32 1.442695, %v1644_v39  ;;  %vm737_vm7 = vcmp.gt.f32.partialorder %v1644_v39, 0.0 }
 0x1d7   : > { %v1232_v46 = vpop.f32.mrf.mxu1 }
 0x1d8   : > { %v755_v47 = vmul.f32 1.442695, %v1647_v44  ;;  %v1652_v48 = vadd.f32 %v1232_v46, %v1634_v25  ;;  %vm735_vm5 = vcmp.gt.f32.partialorder %v1647_v44, 0.0 }
 0x1d9   : > { %v687_v49 = vpop.f32.mrf.mxu1 }
 0x1da   : > { %1361 = vpow2.f32 %v755_v47  ;;  %v761_v43 = vmul.f32 1.442695, %v1652_v48  ;;  %v1656_v50 = vadd.f32 %v1634_v25, %v687_v49  ;;  %vm738_vm4 = vcmp.gt.f32.partialorder %v1652_v48, 0.0 }
 0x1db   : > { %1363 = vpow2.f32 %v759_v45  ;;  %v1235_v41 = vpop.f32.mrf.mxu1 }
 0x1dc   : > { %1365 = vpow2.f32 %v761_v43  ;;  %v757_v51 = vmul.f32 1.442695, %v1656_v50  ;;  %v1660_v52 = vadd.f32 %v1235_v41, %v1634_v25  ;;  %vm736_vm6 = vcmp.gt.f32.partialorder %v1656_v50, 0.0 }
 0x1dd   : > { %v700_v53 = vpop.f32.mrf.mxu1 }
 0x1de   : > { %1367 = vpow2.f32 %v757_v51  ;;  %v767_v54 = vmul.f32 1.442695, %v1660_v52  ;;  %v1664_v56 = vadd.f32 %v1634_v25, %v700_v53  ;;  %vm741_vm11 = vcmp.gt.f32.partialorder %v1660_v52, 0.0 }
 0x1df   : > { %v1354_v40 = vpop.eup %1353  ;;  %v1236_v58 = vpop.f32.mrf.mxu1 }
 0x1e0   : > { %v1356_v59 = vpop.eup %1355  ;;  %v1667_v60 = vadd.f32 %v1236_v58, %v1634_v25  ;;  %v1102_v63 = vadd.f32 -1.0, %v1354_v40  ;;  %v763_v57 = vmul.f32 1.442695, %v1664_v56  ;;  %1369 = vpow2.f32 %v767_v54 }
 0x1e1   : > { %v1358_v62 = vpop.eup %1357  ;;  %v703_v61 = vpop.f32.mrf.mxu1  ;;  %v1104_v4 = vadd.f32 -1.0, %v1356_v59  ;;  %vm739_vm9 = vcmp.gt.f32.partialorder %v1664_v56, 0.0 }
 0x1e2   : > { %v1105_v0 = vadd.f32 -1.0, %v1358_v62  ;;  %v769_v55 = vmul.f32 1.442695, %v1667_v60  ;;  %v1672_v1 = vadd.f32 %v1634_v25, %v703_v61  ;;  %1371 = vpow2.f32 %v763_v57 }
 0x1e3   : > { %v1360_v2 = vpop.eup %1359  ;;  %v1239_v5 = vpop.f32.mrf.mxu1  ;;  %v795_v7 = vsel %vm731_vm0, %v669_v29, %v1102_v63  ;;  %v797_v15 = vsel %vm733_vm3, %v1637_v27, %v1104_v4  ;;  %vm742_vm8 = vcmp.gt.f32.partialorder %v1667_v60, 0.0 }
 0x1e4   : > { %v1103_v6 = vadd.f32 -1.0, %v1360_v2  ;;  %1373 = vpow2.f32 %v769_v55  ;;  %v798_v8 = vsel %vm734_vm1, %v680_v33, %v1105_v0  ;;  %v765_v9 = vmul.f32 1.442695, %v1672_v1  ;;  %v1118_v2 = vld [vmem:[%s1742_s6] ss:$0 sm:$0xff] }
 0x1e5   : > { %v1676_v11 = vadd.f32 %v1239_v5, %v1634_v25  ;;  %v716_v12 = vpop.f32.mrf.mxu1  ;;  %v829_v19 = vpack.c.bf16 %v798_v8, %v797_v15  ;;  %vm740_vm10 = vcmp.gt.f32.partialorder %v1672_v1, 0.0 }
 0x1e6   : > { %v1680_v13 = vadd.f32 %v1634_v25, %v716_v12  ;;  %v796_v10 = vsel %vm732_vm2, %v672_v36, %v1103_v6  ;;  %1375 = vpow2.f32 %v765_v9 }
 0x1e7   : > { %v1362_v14 = vpop.eup %1361  ;;  %v775_v3 = vmul.f32 1.442695, %v1676_v11  ;;  %v1240_v16 = vpop.f32.mrf.mxu1  ;;  %v828_v17 = vpack.c.bf16 %v796_v10, %v795_v7  ;;  %vm745_vm15 = vcmp.gt.f32.partialorder %v1676_v11, 0.0 }
 0x1e8   : > { %v1364_v18 = vpop.eup %1363  ;;  %v771_v20 = vmul.f32 1.442695, %v1680_v13  ;;  %v728_v21 = vadd.f32 %v1240_v16, %v1634_v25  ;;  %v1106_v24 = vadd.f32 -1.0, %v1362_v14  ;;  %vm743_vm13 = vcmp.gt.f32.partialorder %v1680_v13, 0.0 }
 0x1e9   : > { %v1366_v22 = vpop.eup %1365  ;;  %v719_v23 = vpop.f32.mrf.mxu1  ;;  %1257 = vmatprep.mubr.bf16.mxu0 %v828_v17  ;;  %1377 = vpow2.f32 %v775_v3  ;;  %v1108_v29 = vadd.f32 -1.0, %v1364_v18 }
 0x1ea   : > { %v1109_v26 = vadd.f32 -1.0, %v1366_v22  ;;  %v777_v28 = vmul.f32 1.442695, %v728_v21  ;;  %1258 = vmatmul.mubr.bf16.vlgmr.msra.gmra.mxu0 %v829_v19  ;;  %1379 = vpow2.f32 %v771_v20  ;;  %v720_v30 = vadd.f32 %v1634_v25, %v719_v23 }
 0x1eb   : > { %v1368_v27 = vpop.eup %1367  ;;  %v799_v34 = vsel %vm735_vm5, %v1647_v44, %v1106_v24  ;;  %v801_v37 = vsel %vm737_vm7, %v1644_v39, %v1108_v29  ;;  %vm746_vm12 = vcmp.gt.f32.partialorder %v728_v21, 0.0 }
 0x1ec   : > { %v1107_v31 = vadd.f32 -1.0, %v1368_v27  ;;  %1381 = vpow2.f32 %v777_v28  ;;  %v773_v32 = vmul.f32 1.442695, %v720_v30  ;;  %v802_v33 = vsel %vm738_vm4, %v1652_v48, %v1109_v26 }
 0x1ed   : > { %v1370_v36 = vpop.eup %1369  ;;  %v831_v42 = vpack.c.bf16 %v802_v33, %v801_v37  ;;  %vm744_vm14 = vcmp.gt.f32.partialorder %v720_v30, 0.0 }
 0x1ee   : > { %v800_v35 = vsel %vm736_vm6, %v1656_v50, %v1107_v31  ;;  %1383 = vpow2.f32 %v773_v32  ;;  %v1112_v48 = vadd.f32 -1.0, %v1370_v36 }
 0x1ef   : > { %v830_v25 = vpack.c.bf16 %v800_v35, %v799_v34  ;;  %v1372_v38 = vpop.eup %1371 }
 0x1f0   : > { %v1110_v47 = vadd.f32 -1.0, %v1372_v38  ;;  %v805_v53 = vsel %vm741_vm11, %v1660_v52, %v1112_v48 }
 0x1f1   : > { %v1374_v45 = vpop.eup %1373  ;;  %1261 = vmatprep.mubr.bf16.mxu0 %v830_v25 }
 0x1f2   : > { %v1113_v46 = vadd.f32 -1.0, %v1374_v45  ;;  %1262 = vmatmul.mubr.bf16.gmra.mxu0 %v831_v42  ;;  %v803_v39 = vsel %vm739_vm9, %v1664_v56, %v1110_v47 }
 0x1f3   : > { %v1376_v49 = vpop.eup %1375 }
 0x1f4   : > { %v1111_v43 = vadd.f32 -1.0, %v1376_v49  ;;  %v806_v44 = vsel %vm742_vm8, %v1667_v60, %v1113_v46 }
 0x1f5   : > { %v833_v58 = vpack.c.bf16 %v806_v44, %v805_v53 }
 0x1f6   : > { %v1378_v50 = vpop.eup %1377  ;;  %v804_v41 = vsel %vm740_vm10, %v1672_v1, %v1111_v43 }
 0x1f7   : > { %v1380_v51 = vpop.eup %1379  ;;  %v832_v54 = vpack.c.bf16 %v804_v41, %v803_v39  ;;  %v1116_v63 = vadd.f32 -1.0, %v1378_v50 }
 0x1f8   : > { %v1114_v62 = vadd.f32 -1.0, %v1380_v51 }
 0x1f9   : > { %v1382_v40 = vpop.eup %1381  ;;  %1265 = vmatprep.mubr.bf16.mxu1 %v832_v54  ;;  %v809_v55 = vsel %vm745_vm15, %v1676_v11, %v1116_v63 }
 0x1fa   : > { %v1117_v59 = vadd.f32 -1.0, %v1382_v40  ;;  %1266 = vmatmul.mubr.bf16.vlgmr.msra.gmra.mxu1 %v833_v58  ;;  %v807_v52 = vsel %vm743_vm13, %v1680_v13, %v1114_v62 }
 0x1fb   : > { %v1384_v60 = vpop.eup %1383 }
 0x1fc   : > { %v1115_v57 = vadd.f32 -1.0, %v1384_v60  ;;  %v810_v56 = vsel %vm746_vm12, %v728_v21, %v1117_v59 }
 0x1fd   : > { %v835_v1 = vpack.c.bf16 %v810_v56, %v809_v55 }
 0x1fe   : > { %v808_v61 = vsel %vm744_vm14, %v720_v30, %v1115_v57 }
 0x1ff   : > { %v834_v0 = vpack.c.bf16 %v808_v61, %v807_v52 }
 0x201   : > { %1269 = vmatprep.mubr.bf16.mxu1 %v834_v0 }
 0x202   : > { %1270 = vmatmul.mubr.bf16.gmra.mxu1 %v835_v1 }
 0x2aa   : > { %v1259_v4 = vpop.f32.mrf.mxu0 }
 0x2ab   : > { %v933_v5 = vadd.f32 %v1259_v4, %v1118_v2 }
 0x2ac   : > { %v924_v6 = vpop.f32.mrf.mxu0 }
 0x2ad   : > { %989 = vst [vmem:[%s1715_s25 + $0x10] sm:$0xff] %v933_v5  ;;  %v925_v8 = vadd.f32 %v1118_v2, %v924_v6 }
 0x2ae   : > { %v1260_v9 = vpop.f32.mrf.mxu0 }
 0x2af   : > { %987 = vst [vmem:[%s1715_s25] sm:$0xff] %v925_v8  ;;  %v936_v11 = vadd.f32 %v1260_v9, %v1118_v2 }
 0x2b0   : > { %v927_v12 = vpop.f32.mrf.mxu0 }
 0x2b1   : > { %990 = vst [vmem:[%s1715_s25 + $0x18] sm:$0xff] %v936_v11  ;;  %v928_v13 = vadd.f32 %v1118_v2, %v927_v12 }
 0x2b2   : > { %v1263_v7 = vpop.f32.mrf.mxu0 }
 0x2b3   : > { %988 = vst [vmem:[%s1715_s25 + $0x8] sm:$0xff] %v928_v13  ;;  %v949_v10 = vadd.f32 %v1263_v7, %v1118_v2 }
 0x2b4   : > { %v940_v14 = vpop.f32.mrf.mxu0 }
 0x2b5   : > { %993 = vst [vmem:[%s1715_s25 + $0x30] sm:$0xff] %v949_v10  ;;  %v941_v15 = vadd.f32 %v1118_v2, %v940_v14 }
 0x2b6   : > { %v1264_v3 = vpop.f32.mrf.mxu0 }
 0x2b7   : > { %991 = vst [vmem:[%s1715_s25 + $0x20] sm:$0xff] %v941_v15  ;;  %v952_v16 = vadd.f32 %v1264_v3, %v1118_v2 }
 0x2b8   : > { %v943_v17 = vpop.f32.mrf.mxu0 }
 0x2b9   : > { %994 = vst [vmem:[%s1715_s25 + $0x38] sm:$0xff] %v952_v16  ;;  %v944_v18 = vadd.f32 %v1118_v2, %v943_v17 }
 0x2ba   : > { %v1267_v19 = vpop.f32.mrf.mxu1 }
 0x2bb   : > { %992 = vst [vmem:[%s1715_s25 + $0x28] sm:$0xff] %v944_v18  ;;  %v965_v20 = vadd.f32 %v1267_v19, %v1118_v2 }
 0x2bc   : > { %v956_v21 = vpop.f32.mrf.mxu1 }
 0x2bd   : > { %997 = vst [vmem:[%s1715_s25 + $0x50] sm:$0xff] %v965_v20  ;;  %v957_v22 = vadd.f32 %v1118_v2, %v956_v21 }
 0x2be   : > { %v1268_v23 = vpop.f32.mrf.mxu1 }
 0x2bf   : > { %995 = vst [vmem:[%s1715_s25 + $0x40] sm:$0xff] %v957_v22  ;;  %v968_v24 = vadd.f32 %v1268_v23, %v1118_v2 }
 0x2c0   : > { %v959_v26 = vpop.f32.mrf.mxu1 }
 0x2c1   : > { %998 = vst [vmem:[%s1715_s25 + $0x58] sm:$0xff] %v968_v24  ;;  %v960_v28 = vadd.f32 %v1118_v2, %v959_v26 }
 0x2c2   : > { %v1271_v27 = vpop.f32.mrf.mxu1 }
 0x2c3   : > { %996 = vst [vmem:[%s1715_s25 + $0x48] sm:$0xff] %v960_v28  ;;  %v981_v29 = vadd.f32 %v1271_v27, %v1118_v2 }
 0x2c4   : > { %v972_v30 = vpop.f32.mrf.mxu1 }
 0x2c5   : > { %1001 = vst [vmem:[%s1715_s25 + $0x70] sm:$0xff] %v981_v29  ;;  %v973_v31 = vadd.f32 %v1118_v2, %v972_v30 }
 0x2c6   : > { %v1272_v32 = vpop.f32.mrf.mxu1 }
 0x2c7   : > { %999 = vst [vmem:[%s1715_s25 + $0x60] sm:$0xff] %v973_v31  ;;  %v984_v33 = vadd.f32 %v1272_v32, %v1118_v2 }
 0x2c8   : > { %v975_v34 = vpop.f32.mrf.mxu1 }
 0x2c9   : > { %1002 = vst [vmem:[%s1715_s25 + $0x78] sm:$0xff] %v984_v33  ;;  %v976_v35 = vadd.f32 %v1118_v2, %v975_v34 }
 0x2cb   : > { %1000 = vst [vmem:[%s1715_s25 + $0x68] sm:$0xff] %v976_v35 }
 0x2cc PF: > { %s17_s24 = sadd.s32 1, %s1391_s24  }
 0x2cd   : > { %p14_p4 = scmp.ge.s32.totalorder %s17_s24, 4  }
 0x2cf   :  { %16 = sbr.rel (!%p14_p4) target bundleno = 1 (0x1), region = 78 }

</bundles_post_ra>
